<compile_context>
chip_gen: v7x
topology: tpu7x:2x2x1
jax: 0.10.0
libtpu: 0.0.40
codegen_flags: <defaults>
</compile_context>

<pallas_src>
import jax
import jax.numpy as jnp
from jax import lax
from jax.experimental import pallas as pl
from jax.experimental.pallas import tpu as pltpu
import numpy as np

# ---- synthetic config (mirrors argParser / GraphDataset sizes, small) ----
NUM_USERS = 48
NUM_ITEMS = 80
N = NUM_USERS + NUM_ITEMS          # 128 total graph nodes
EMBED_DIM = 32                     # args.embedding_dim
NUM_LAYERS = 2                     # args.num_layers -> behaviour depths 0..2
BATCH = 8                          # len(userIDs) == len(itemIDs)
FINAL_INTEGRATION = "MEAN"         # args.final_integration


# ----------------------------- Pallas kernel -------------------------------

def pdoda_fused_kernel(adj_ref, emb_ref, ids_ref, out_ref, final_ref):
    """Fused PDODA forward (MEAN integration, eval mode), single invocation.

    adj_ref   : (N, N)      bf16 normalized adjacency (resident in VMEM)
    emb_ref   : (L+1, N, D) bf16 per-depth embedding tables (users ++ items)
    ids_ref   : (2B,)       int32 SMEM: [userIDs ; itemIDs + NUM_USERS]
    out_ref   : (B, D)      f32 ratingPreds = userEmb * itemEmb
    final_ref : (N, D)      f32 VMEM scratch holding the final embedding
    """
    num_depths = emb_ref.shape[0]             # L + 1
    L = num_depths - 1
    # Weight of the A^k @ E_d term in finalEmbedding: 1 / ((d+1) * (L+1))
    # (per-depth mean over propagation steps, then MEAN over depths) --
    # plain Python reciprocals, zero in-kernel divides.
    inv_L1 = 1.0 / float(L + 1)
    w = [inv_L1 / float(d + 1) for d in range(num_depths)]

    adj = adj_ref[...]                         # (N, N) bf16 -> MXU operand

    # Horner-form propagation:
    #   c_k = sum_{d >= k} w_d * E_d
    #   final = c_0 + A @ (c_1 + A @ (... + A @ c_L))
    # Every matmul RHS starts at lane 0 (no unaligned slab slices); weighted
    # sums stay in f32 on the VPU, matmuls run bf16 on the MXU with f32 acc.
    c = w[L] * emb_ref[L].astype(jnp.float32)      # c_L
    t = c                                          # t_L
    for k in range(L - 1, -1, -1):                 # statically unrolled (L = 2)
        c = c + w[k] * emb_ref[k].astype(jnp.float32)             # c_k
        t = c + jnp.dot(adj, t.astype(adj.dtype),                 # t_k
                        preferred_element_type=jnp.float32)
    final_ref[...] = t                             # stays resident in VMEM

    # Fused rating head: scalar-indexed row gather driven by SMEM ids
    # (exact, no one-hot matmul, no MXU fill/drain).  Out-of-range ids would
    # silently read whatever VMEM row sits at that offset (no bounds check),
    # unlike the PyTorch reference which would raise.
    B = out_ref.shape[0]
    for b in range(B):                             # statically unrolled (B = 8)
        u_row = final_ref[pl.ds(ids_ref[b], 1), :]           # (1, D)
        i_row = final_ref[pl.ds(ids_ref[B + b], 1), :]       # (1, D)
        out_ref[pl.ds(b, 1), :] = u_row * i_row
    # TODO(synk): SSL InfoNCE losses (lossK/lossL) are computed inside
    # propagation() in the reference but discarded by forward(); not implemented.


# ----------------------------- wrapper --------------------------------------

def pdoda_forward(adj, embeds, user_ids, item_ids):
    """adj: (N, N) f32 normalized adjacency; embeds: (L+1, N, D) f32;
    user_ids/item_ids: (B,) int. Returns ratingPreds (B, D) in f32."""
    assert FINAL_INTEGRATION == "MEAN"
    # bf16 MXU operands / HBM stream; accumulation stays f32 inside the kernel.
    adj_lp = adj.astype(jnp.bfloat16)
    emb_lp = embeds.astype(jnp.bfloat16)
    # Item rows of the final embedding live at [NUM_USERS:]; fold that offset
    # here and ship a single (2B,) scalar vector through SMEM.
    ids = jnp.concatenate(
        [user_ids.astype(jnp.int32),
         item_ids.astype(jnp.int32) + NUM_USERS], axis=0)         # (2B,)

    vmem = pl.BlockSpec(memory_space=pltpu.MemorySpace.VMEM)
    smem = pl.BlockSpec(memory_space=pltpu.MemorySpace.SMEM)
    return pl.pallas_call(
        pdoda_fused_kernel,
        out_shape=jax.ShapeDtypeStruct((user_ids.shape[0], EMBED_DIM), jnp.float32),
        in_specs=[vmem, vmem, smem],       # everything resident, no grid
        out_specs=vmem,
        scratch_shapes=[pltpu.VMEM((N, EMBED_DIM), jnp.float32)],
    )(adj_lp, emb_lp, ids)
    # NOTE(scaling): at realistic graph sizes the dense (N, N) adjacency must be
    # row-tiled -- grid (rows, K) with the contraction axis last, (TM, TK) adj
    # blocks, per-row f32 accumulator scratch with pl.when init/writeback,
    # dimension_semantics=("parallel", "arbitrary") so v7x shards row tiles
    # across its 2 TensorCores, and pltpu.CompilerParams(vmem_limit_bytes=...)
    # re-derived for v7x's 64 MiB VMEM.  Better still: keep the adjacency
    # sparse (scalar-prefetched CSR offsets + pl.ANY + make_async_copy).  At
    # N = 128 the whole-resident gridless form used here is fastest.
    # TODO(synk): optional fp8 (e4m3) adjacency operand on v7x only.


# --------------------------- pure-JAX reference -----------------------------

def reference_forward(adj, embeds, user_ids, item_ids):
    outs = []
    for d in range(NUM_LAYERS + 1):
        cur = embeds[d]
        s = cur
        for _ in range(d):
            cur = adj @ cur
            s = s + cur
        outs.append(s / float(d + 1))
    final = jnp.mean(jnp.stack(outs, 0), axis=0)
    ue = final[:NUM_USERS][user_ids]
    ie = final[NUM_USERS:][item_ids]
    return ue * ie


# --------------------------------- main -------------------------------------

if __name__ == "__main__":
    key = jax.random.PRNGKey(0)
    k_emb_u, k_emb_i, k_adj, k_uid, k_iid = jax.random.split(key, 5)

    # Per-depth embedding tables, init ~ N(0, 0.1) like nn.init.normal_(std=0.1)
    user_tabs = 0.1 * jax.random.normal(
        k_emb_u, (NUM_LAYERS + 1, NUM_USERS, EMBED_DIM), dtype=jnp.float32)
    item_tabs = 0.1 * jax.random.normal(
        k_emb_i, (NUM_LAYERS + 1, NUM_ITEMS, EMBED_DIM), dtype=jnp.float32)
    embeds = jnp.concatenate([user_tabs, item_tabs], axis=1)   # (L+1, N, D)

    # Synthetic symmetric-normalized bipartite adjacency (stand-in for getNormAdj)
    R = (jax.random.uniform(k_adj, (NUM_USERS, NUM_ITEMS)) < 0.1).astype(jnp.float32)
    A = jnp.zeros((N, N), dtype=jnp.float32)
    A = A.at[:NUM_USERS, NUM_USERS:].set(R)
    A = A.at[NUM_USERS:, :NUM_USERS].set(R.T)
    deg = A.sum(axis=1)
    d_inv_sqrt = jnp.where(deg > 0, lax.rsqrt(jnp.maximum(deg, 1e-12)), 0.0)
    adj = d_inv_sqrt[:, None] * A * d_inv_sqrt[None, :]

    user_ids = jax.random.randint(k_uid, (BATCH,), 0, NUM_USERS)
    item_ids = jax.random.randint(k_iid, (BATCH,), 0, NUM_ITEMS)

    out = jax.jit(pdoda_forward)(adj, embeds, user_ids, item_ids)
    out = jax.block_until_ready(out)

    ref = reference_forward(adj, embeds, user_ids, item_ids)
    # Tolerance loosened vs. the pure-f32 version: adjacency / embedding
    # storage and MXU operands are bf16 (accumulation f32).
    np.testing.assert_allclose(np.asarray(out), np.asarray(ref), rtol=5e-2, atol=2e-3)

    print("KERNEL_OK")
</pallas_src>

<mosaic_0001>
module attributes {stable_mosaic.version = 11 : i64} {
  func.func @pdoda_fused_kernel(%arg0: memref<128x128xbf16, #tpu.memory_space<vmem>>, %arg1: memref<3x128x32xbf16, #tpu.memory_space<vmem>>, %arg2: memref<16xi32, #tpu.memory_space<smem>>, %arg3: memref<8x32xf32, #tpu.memory_space<vmem>>, %arg4: memref<128x32xf32, #tpu.memory_space<vmem>>) attributes {dimension_semantics = [], scalar_prefetch = 0 : i64, scratch_operands = 1 : i64, tpu.core_type = #tpu.core_type<tc>} {
    %c0 = arith.constant 0 : index
    %c0_0 = arith.constant 0 : index
    %0 = vector.load %arg0[%c0, %c0_0] : memref<128x128xbf16, #tpu.memory_space<vmem>>, vector<128x128xbf16>
    %c2 = arith.constant 2 : index
    %c0_1 = arith.constant 0 : index
    %c0_2 = arith.constant 0 : index
    %1 = vector.load %arg1[%c2, %c0_1, %c0_2] : memref<3x128x32xbf16, #tpu.memory_space<vmem>>, vector<1x128x32xbf16>
    %2 = vector.shape_cast %1 : vector<1x128x32xbf16> to vector<128x32xbf16>
    %3 = arith.extf %2 : vector<128x32xbf16> to vector<128x32xf32>
    %cst = arith.constant 0.111111112 : f32
    %4 = vector.broadcast %cst : f32 to vector<128x32xf32>
    %5 = arith.mulf %4, %3 : vector<128x32xf32>
    %c1 = arith.constant 1 : index
    %c0_3 = arith.constant 0 : index
    %c0_4 = arith.constant 0 : index
    %6 = vector.load %arg1[%c1, %c0_3, %c0_4] : memref<3x128x32xbf16, #tpu.memory_space<vmem>>, vector<1x128x32xbf16>
    %7 = vector.shape_cast %6 : vector<1x128x32xbf16> to vector<128x32xbf16>
    %8 = arith.extf %7 : vector<128x32xbf16> to vector<128x32xf32>
    %cst_5 = arith.constant 0.166666672 : f32
    %9 = vector.broadcast %cst_5 : f32 to vector<128x32xf32>
    %10 = arith.mulf %9, %8 : vector<128x32xf32>
    %11 = arith.addf %5, %10 : vector<128x32xf32>
    %12 = arith.truncf %5 : vector<128x32xf32> to vector<128x32xbf16>
    %cst_6 = arith.constant dense<0.000000e+00> : vector<128x32xf32>
    %13 = tpu.matmul %0, %12, %cst_6 {dimension_numbers = #tpu.dot_dimension_numbers<[1], [0], [0], [1], [0, 0, 1, 1], [], []>} : vector<128x128xbf16>, vector<128x32xbf16>, vector<128x32xf32> -> vector<128x32xf32>
    %14 = arith.addf %11, %13 : vector<128x32xf32>
    %c0_7 = arith.constant 0 : index
    %c0_8 = arith.constant 0 : index
    %c0_9 = arith.constant 0 : index
    %15 = vector.load %arg1[%c0_7, %c0_8, %c0_9] : memref<3x128x32xbf16, #tpu.memory_space<vmem>>, vector<1x128x32xbf16>
    %16 = vector.shape_cast %15 : vector<1x128x32xbf16> to vector<128x32xbf16>
    %17 = arith.extf %16 : vector<128x32xbf16> to vector<128x32xf32>
    %cst_10 = arith.constant 0.333333343 : f32
    %18 = vector.broadcast %cst_10 : f32 to vector<128x32xf32>
    %19 = arith.mulf %18, %17 : vector<128x32xf32>
    %20 = arith.addf %11, %19 : vector<128x32xf32>
    %21 = arith.truncf %14 : vector<128x32xf32> to vector<128x32xbf16>
    %cst_11 = arith.constant dense<0.000000e+00> : vector<128x32xf32>
    %22 = tpu.matmul %0, %21, %cst_11 {dimension_numbers = #tpu.dot_dimension_numbers<[1], [0], [0], [1], [0, 0, 1, 1], [], []>} : vector<128x128xbf16>, vector<128x32xbf16>, vector<128x32xf32> -> vector<128x32xf32>
    %23 = arith.addf %20, %22 : vector<128x32xf32>
    %c0_12 = arith.constant 0 : index
    %c0_13 = arith.constant 0 : index
    %24 = vector.load %arg4[%c0_12, %c0_13] : memref<128x32xf32, #tpu.memory_space<vmem>>, vector<128x32xf32>
    tpu.vector_store %arg4[%c0_12, %c0_13], %23 {strides = array<i32>} : memref<128x32xf32, #tpu.memory_space<vmem>>, vector<128x32xf32>,
    %c0_14 = arith.constant 0 : index
    %25 = memref.load %arg2[%c0_14] : memref<16xi32, #tpu.memory_space<smem>>
    %26 = arith.index_cast %25 : i32 to index
    %c0_15 = arith.constant 0 : index
    %27 = vector.load %arg4[%26, %c0_15] : memref<128x32xf32, #tpu.memory_space<vmem>>, vector<1x32xf32>
    %c8 = arith.constant 8 : index
    %28 = memref.load %arg2[%c8] : memref<16xi32, #tpu.memory_space<smem>>
    %29 = arith.index_cast %28 : i32 to index
    %c0_16 = arith.constant 0 : index
    %30 = vector.load %arg4[%29, %c0_16] : memref<128x32xf32, #tpu.memory_space<vmem>>, vector<1x32xf32>
    %31 = arith.mulf %27, %30 : vector<1x32xf32>
    %c0_17 = arith.constant 0 : index
    %c0_18 = arith.constant 0 : index
    %32 = vector.load %arg3[%c0_17, %c0_18] : memref<8x32xf32, #tpu.memory_space<vmem>>, vector<1x32xf32>
    tpu.vector_store %arg3[%c0_17, %c0_18], %31 {strides = array<i32>} : memref<8x32xf32, #tpu.memory_space<vmem>>, vector<1x32xf32>,
    %c1_19 = arith.constant 1 : index
    %33 = memref.load %arg2[%c1_19] : memref<16xi32, #tpu.memory_space<smem>>
    %34 = arith.index_cast %33 : i32 to index
    %c0_20 = arith.constant 0 : index
    %35 = vector.load %arg4[%34, %c0_20] : memref<128x32xf32, #tpu.memory_space<vmem>>, vector<1x32xf32>
    %c9 = arith.constant 9 : index
    %36 = memref.load %arg2[%c9] : memref<16xi32, #tpu.memory_space<smem>>
    %37 = arith.index_cast %36 : i32 to index
    %c0_21 = arith.constant 0 : index
    %38 = vector.load %arg4[%37, %c0_21] : memref<128x32xf32, #tpu.memory_space<vmem>>, vector<1x32xf32>
    %39 = arith.mulf %35, %38 : vector<1x32xf32>
    %c1_22 = arith.constant 1 : index
    %c0_23 = arith.constant 0 : index
    %40 = vector.load %arg3[%c1_22, %c0_23] : memref<8x32xf32, #tpu.memory_space<vmem>>, vector<1x32xf32>
    tpu.vector_store %arg3[%c1_22, %c0_23], %39 {strides = array<i32>} : memref<8x32xf32, #tpu.memory_space<vmem>>, vector<1x32xf32>,
    %c2_24 = arith.constant 2 : index
    %41 = memref.load %arg2[%c2_24] : memref<16xi32, #tpu.memory_space<smem>>
    %42 = arith.index_cast %41 : i32 to index
    %c0_25 = arith.constant 0 : index
    %43 = vector.load %arg4[%42, %c0_25] : memref<128x32xf32, #tpu.memory_space<vmem>>, vector<1x32xf32>
    %c10 = arith.constant 10 : index
    %44 = memref.load %arg2[%c10] : memref<16xi32, #tpu.memory_space<smem>>
    %45 = arith.index_cast %44 : i32 to index
    %c0_26 = arith.constant 0 : index
    %46 = vector.load %arg4[%45, %c0_26] : memref<128x32xf32, #tpu.memory_space<vmem>>, vector<1x32xf32>
    %47 = arith.mulf %43, %46 : vector<1x32xf32>
    %c2_27 = arith.constant 2 : index
    %c0_28 = arith.constant 0 : index
    %48 = vector.load %arg3[%c2_27, %c0_28] : memref<8x32xf32, #tpu.memory_space<vmem>>, vector<1x32xf32>
    tpu.vector_store %arg3[%c2_27, %c0_28], %47 {strides = array<i32>} : memref<8x32xf32, #tpu.memory_space<vmem>>, vector<1x32xf32>,
    %c3 = arith.constant 3 : index
    %49 = memref.load %arg2[%c3] : memref<16xi32, #tpu.memory_space<smem>>
    %50 = arith.index_cast %49 : i32 to index
    %c0_29 = arith.constant 0 : index
    %51 = vector.load %arg4[%50, %c0_29] : memref<128x32xf32, #tpu.memory_space<vmem>>, vector<1x32xf32>
    %c11 = arith.constant 11 : index
    %52 = memref.load %arg2[%c11] : memref<16xi32, #tpu.memory_space<smem>>
    %53 = arith.index_cast %52 : i32 to index
    %c0_30 = arith.constant 0 : index
    %54 = vector.load %arg4[%53, %c0_30] : memref<128x32xf32, #tpu.memory_space<vmem>>, vector<1x32xf32>
    %55 = arith.mulf %51, %54 : vector<1x32xf32>
    %c3_31 = arith.constant 3 : index
    %c0_32 = arith.constant 0 : index
    %56 = vector.load %arg3[%c3_31, %c0_32] : memref<8x32xf32, #tpu.memory_space<vmem>>, vector<1x32xf32>
    tpu.vector_store %arg3[%c3_31, %c0_32], %55 {strides = array<i32>} : memref<8x32xf32, #tpu.memory_space<vmem>>, vector<1x32xf32>,
    %c4 = arith.constant 4 : index
    %57 = memref.load %arg2[%c4] : memref<16xi32, #tpu.memory_space<smem>>
    %58 = arith.index_cast %57 : i32 to index
    %c0_33 = arith.constant 0 : index
    %59 = vector.load %arg4[%58, %c0_33] : memref<128x32xf32, #tpu.memory_space<vmem>>, vector<1x32xf32>
    %c12 = arith.constant 12 : index
    %60 = memref.load %arg2[%c12] : memref<16xi32, #tpu.memory_space<smem>>
    %61 = arith.index_cast %60 : i32 to index
    %c0_34 = arith.constant 0 : index
    %62 = vector.load %arg4[%61, %c0_34] : memref<128x32xf32, #tpu.memory_space<vmem>>, vector<1x32xf32>
    %63 = arith.mulf %59, %62 : vector<1x32xf32>
    %c4_35 = arith.constant 4 : index
    %c0_36 = arith.constant 0 : index
    %64 = vector.load %arg3[%c4_35, %c0_36] : memref<8x32xf32, #tpu.memory_space<vmem>>, vector<1x32xf32>
    tpu.vector_store %arg3[%c4_35, %c0_36], %63 {strides = array<i32>} : memref<8x32xf32, #tpu.memory_space<vmem>>, vector<1x32xf32>,
    %c5 = arith.constant 5 : index
    %65 = memref.load %arg2[%c5] : memref<16xi32, #tpu.memory_space<smem>>
    %66 = arith.index_cast %65 : i32 to index
    %c0_37 = arith.constant 0 : index
    %67 = vector.load %arg4[%66, %c0_37] : memref<128x32xf32, #tpu.memory_space<vmem>>, vector<1x32xf32>
    %c13 = arith.constant 13 : index
    %68 = memref.load %arg2[%c13] : memref<16xi32, #tpu.memory_space<smem>>
    %69 = arith.index_cast %68 : i32 to index
    %c0_38 = arith.constant 0 : index
    %70 = vector.load %arg4[%69, %c0_38] : memref<128x32xf32, #tpu.memory_space<vmem>>, vector<1x32xf32>
    %71 = arith.mulf %67, %70 : vector<1x32xf32>
    %c5_39 = arith.constant 5 : index
    %c0_40 = arith.constant 0 : index
    %72 = vector.load %arg3[%c5_39, %c0_40] : memref<8x32xf32, #tpu.memory_space<vmem>>, vector<1x32xf32>
    tpu.vector_store %arg3[%c5_39, %c0_40], %71 {strides = array<i32>} : memref<8x32xf32, #tpu.memory_space<vmem>>, vector<1x32xf32>,
    %c6 = arith.constant 6 : index
    %73 = memref.load %arg2[%c6] : memref<16xi32, #tpu.memory_space<smem>>
    %74 = arith.index_cast %73 : i32 to index
    %c0_41 = arith.constant 0 : index
    %75 = vector.load %arg4[%74, %c0_41] : memref<128x32xf32, #tpu.memory_space<vmem>>, vector<1x32xf32>
    %c14 = arith.constant 14 : index
    %76 = memref.load %arg2[%c14] : memref<16xi32, #tpu.memory_space<smem>>
    %77 = arith.index_cast %76 : i32 to index
    %c0_42 = arith.constant 0 : index
    %78 = vector.load %arg4[%77, %c0_42] : memref<128x32xf32, #tpu.memory_space<vmem>>, vector<1x32xf32>
    %79 = arith.mulf %75, %78 : vector<1x32xf32>
    %c6_43 = arith.constant 6 : index
    %c0_44 = arith.constant 0 : index
    %80 = vector.load %arg3[%c6_43, %c0_44] : memref<8x32xf32, #tpu.memory_space<vmem>>, vector<1x32xf32>
    tpu.vector_store %arg3[%c6_43, %c0_44], %79 {strides = array<i32>} : memref<8x32xf32, #tpu.memory_space<vmem>>, vector<1x32xf32>,
    %c7 = arith.constant 7 : index
    %81 = memref.load %arg2[%c7] : memref<16xi32, #tpu.memory_space<smem>>
    %82 = arith.index_cast %81 : i32 to index
    %c0_45 = arith.constant 0 : index
    %83 = vector.load %arg4[%82, %c0_45] : memref<128x32xf32, #tpu.memory_space<vmem>>, vector<1x32xf32>
    %c15 = arith.constant 15 : index
    %84 = memref.load %arg2[%c15] : memref<16xi32, #tpu.memory_space<smem>>
    %85 = arith.index_cast %84 : i32 to index
    %c0_46 = arith.constant 0 : index
    %86 = vector.load %arg4[%85, %c0_46] : memref<128x32xf32, #tpu.memory_space<vmem>>, vector<1x32xf32>
    %87 = arith.mulf %83, %86 : vector<1x32xf32>
    %c7_47 = arith.constant 7 : index
    %c0_48 = arith.constant 0 : index
    %88 = vector.load %arg3[%c7_47, %c0_48] : memref<8x32xf32, #tpu.memory_space<vmem>>, vector<1x32xf32>
    tpu.vector_store %arg3[%c7_47, %c0_48], %87 {strides = array<i32>} : memref<8x32xf32, #tpu.memory_space<vmem>>, vector<1x32xf32>,
    return
  }
}

</mosaic_0001>

<bundles_post_ra>
// kernel: pdoda_forward.1
= control target key start
LH: loop header
LB: loop body
LE: loop exit
PB: predicated region body
PF: predicated region fallthrough
CT: control target
= control target key end

     0   :  { %8 = vsyncpa [#allocation5], 0  ;;  %s1308_s0 = inlined_call_operand.vmem [shape: bf16[128,128], index: 0, kind: input, shape index: {}]   ;;  %s1309_s1 = inlined_call_operand.vmem [shape: bf16[3,128,32], index: 1, kind: input, shape index: {}]   ;;  %s1310_s2 = inlined_call_operand.vmem [shape: s32[16], index: 2, kind: input, shape index: {}]   ;;  %s1311_s3 = inlined_call_operand.hbm [shape: f32[8,32], index: 3, kind: output, shape index: {}]  }
   0x1   :  { %9 = vsyncpa [#allocation4], 0  ;;  %s20_s14 = sshll.u32 %s1310_s2, 4  ;;  %s21_s14 = int_to_ptr.vmem [resolvable:$true] %s20_s14 }
   0x2   :  { %s906_s15 = scalar_lea.vmem %s21_s14, 16  ;;  %p911_p1 = scmp.lt.s32.totalorder %s21_s14, %s21_s14 }
   0x3   :  { %p907_p0 = scmp.ne.s32.totalorder %s21_s14, %s906_s15  ;;  %p912_p2 = scmp.lt.s32.totalorder %s906_s15, %s906_s15 }
   0x5   :  { %p913_p3 = por %p912_p2, %p911_p1 }
   0x7   :  { %p914_p4 = pnand %p913_p3, %p907_p0 }
   0x9   :  { %917 = shalt.err (!%p914_p4)
}
   0xa   :  { %s944_s16 = smov [#allocation3]  }
   0xb   :  { %23 = dma.vmem_to_smem %s21_s14, 16, %s944_s16, [#allocation5]  }
   0xc   :  { %940 = dma.done.wait [#allocation5], 16  }
   0xd   :  { %941 = vsyncadd [#allocation5], 4294967280 }
   0xe   :  { %27 = sfence }
   0xf   :  { %v777_v0 = vld [vmem:[%s1309_s1 + $0x80] sm:$0xff]   ;;  %v778_v1 = vld [vmem:[%s1309_s1 + $0x88] sm:$0xff]   ;;  %v779_v2 = vld [vmem:[%s1309_s1 + $0x90] sm:$0xff]   ;;  %vm513_vm0 = vcmask 261120   ;;  %s1227_s23 = sld [smem:[#allocation3 + $0x8]]  ;;  %s1235_s24 = sld [smem:[#allocation3 + $0x9]] }
  0x10   :  { %v683_v3 = vunpack.c.l.bf16 %v777_v0  ;;  %v684_v4 = vunpack.c.h.bf16 %v777_v0  ;;  %v687_v5 = vunpack.c.l.bf16 %v778_v1  ;;  %v688_v6 = vunpack.c.h.bf16 %v778_v1  ;;  %v780_v7 = vld [vmem:[%s1309_s1 + $0x98] sm:$0xff]   ;;  %v781_v19 = vld [vmem:[%s1309_s1 + $0xa0] sm:$0xff]   ;;  %v782_v27 = vld [vmem:[%s1309_s1 + $0xa8] sm:$0xff]   ;;  %s1239_s25 = sld [smem:[#allocation3 + $0x2]]  ;;  %s1244_s27 = sld [smem:[#allocation3 + $0x3]] }
  0x11   :  { %v691_v8 = vunpack.c.l.bf16 %v779_v2  ;;  %v692_v9 = vunpack.c.h.bf16 %v779_v2  ;;  %v695_v14 = vunpack.c.l.bf16 %v780_v7  ;;  %v696_v18 = vunpack.c.h.bf16 %v780_v7  ;;  %v898_v21 = vld [vmem:[%s1308_s0] sm:$0xff]   ;;  %v783_v28 = vld [vmem:[%s1309_s1 + $0xb0] sm:$0xff]   ;;  %v784_v39 = vld [vmem:[%s1309_s1 + $0xb8] sm:$0xff]   ;;  %s1241_s26 = sld [smem:[#allocation3 + $0xa]]  ;;  %s1246_s28 = sld [smem:[#allocation3 + $0xb]] }
  0x12   :  { %v981_v10 = vmul.f32 0.11111111, %v683_v3  ;;  %v983_v11 = vmul.f32 0.11111111, %v684_v4  ;;  %v985_v12 = vmul.f32 0.11111111, %v687_v5  ;;  %v699_v22 = vunpack.c.l.bf16 %v781_v19  ;;  %848 = vmatprep.mubr.bf16.mxu0 %v898_v21  ;;  %880 = vmatprep.mubr.bf16.mxu1 %v898_v21 }
  0x13   :  { %v987_v13 = vmul.f32 0.11111111, %v688_v6  ;;  %v991_v16 = vmul.f32 0.11111111, %v691_v8  ;;  %v993_v17 = vmul.f32 0.11111111, %v692_v9  ;;  %v700_v26 = vunpack.c.h.bf16 %v781_v19 }
  0x14   :  { %v159_v15 = vpack.c.bf16 %v983_v11, %v981_v10  ;;  %v1005_v24 = vmul.f32 0.11111111, %v695_v14  ;;  %v1007_v25 = vmul.f32 0.11111111, %v696_v18  ;;  %v1015_v29 = vmul.f32 0.11111111, %v699_v22 }
  0x15   :  { %v160_v20 = vpack.c.bf16 %v987_v13, %v985_v12  ;;  %v161_v23 = vpack.c.bf16 %v993_v17, %v991_v16  ;;  %v1019_v31 = vmul.f32 0.11111111, %v700_v26  ;;  %v703_v32 = vunpack.c.l.bf16 %v782_v27  ;;  %v1047_v49 = vld [vmem:[%s1308_s0 + $0x8] sm:$0xff]   ;;  %v1052_v50 = vld [vmem:[%s1308_s0 + $0x10] sm:$0xff]   ;;  %v1059_v51 = vld [vmem:[%s1308_s0 + $0x18] sm:$0xff]   ;;  %s1249_s29 = sld [smem:[#allocation3 + $0x4]] }
  0x16   :  { %832 = vmatprep.subr.bf16.mxu0 %v159_v15  ;;  %v162_v30 = vpack.c.bf16 %v1007_v25, %v1005_v24  ;;  %v704_v33 = vunpack.c.h.bf16 %v782_v27  ;;  %v707_v34 = vunpack.c.l.bf16 %v783_v28  ;;  %v708_v38 = vunpack.c.h.bf16 %v783_v28  ;;  %v1064_v52 = vld [vmem:[%s1308_s0 + $0x20] sm:$0xff]   ;;  %v1071_v53 = vld [vmem:[%s1308_s0 + $0x28] sm:$0xff]   ;;  %v1076_v54 = vld [vmem:[%s1308_s0 + $0x30] sm:$0xff]   ;;  %s1251_s30 = sld [smem:[#allocation3 + $0xc]]  ;;  %s1253_s4 = sld [smem:[#allocation3 + $0x5]] }
  0x17   :  { %833 = vmatpush3.bf16.msra.mxu0 %v159_v15  ;;  %v163_v35 = vpack.c.bf16 %v1019_v31, %v1015_v29  ;;  %v1023_v36 = vmul.f32 0.11111111, %v703_v32  ;;  %v711_v40 = vunpack.c.l.bf16 %v784_v39  ;;  %v712_v44 = vunpack.c.h.bf16 %v784_v39  ;;  %v1083_v55 = vld [vmem:[%s1308_s0 + $0x38] sm:$0xff]   ;;  %v786_v56 = vld [vmem:[%s1309_s1 + $0x48] sm:$0xff]   ;;  %v785_v58 = vld [vmem:[%s1309_s1 + $0x40] sm:$0xff]   ;;  %s1233_s0 = sld [smem:[#allocation3 + $0x1]] }
  0x18   :  { %834 = vmatprep.subr.bf16.mxu0 %v160_v20  ;;  %v1025_v37 = vmul.f32 0.11111111, %v704_v33  ;;  %v1032_v42 = vmul.f32 0.11111111, %v707_v34  ;;  %v1034_v43 = vmul.f32 0.11111111, %v708_v38  ;;  %v719_v57 = vunpack.c.l.bf16 %v786_v56 }
  0x19   :  { %v1038_v46 = vmul.f32 0.11111111, %v711_v40  ;;  %v1040_v47 = vmul.f32 0.11111111, %v712_v44  ;;  %v720_v59 = vunpack.c.h.bf16 %v786_v56  ;;  %v715_v60 = vunpack.c.l.bf16 %v785_v58  ;;  %v788_v2 = vld [vmem:[%s1309_s1 + $0x58] sm:$0xff]   ;;  %v787_v4 = vld [vmem:[%s1309_s1 + $0x50] sm:$0xff]  }
  0x1a   :  { %v164_v41 = vpack.c.bf16 %v1025_v37, %v1023_v36  ;;  %v165_v45 = vpack.c.bf16 %v1034_v43, %v1032_v42  ;;  %v716_v61 = vunpack.c.h.bf16 %v785_v58  ;;  %v129_v62 = vmul.f32 0.16666667, %v719_v57  ;;  %v789_v32 = vld [vmem:[%s1309_s1 + $0x60] sm:$0xff]   ;;  %s1255_s5 = sld [smem:[#allocation3 + $0xd]]  ;;  %s1258_s6 = sld [smem:[#allocation3 + $0x6]] }
  0x1b   :  { %835 = vmatpush3.bf16.msra.mxu0 %v160_v20  ;;  %v166_v48 = vpack.c.bf16 %v1040_v47, %v1038_v46  ;;  %v130_v63 = vmul.f32 0.16666667, %v720_v59  ;;  %v127_v0 = vmul.f32 0.16666667, %v715_v60  ;;  %v727_v6 = vunpack.c.l.bf16 %v788_v2  ;;  %s1260_s7 = sld [smem:[#allocation3 + $0xe]]  ;;  %s1263_s8 = sld [smem:[#allocation3 + $0x7]] }
  0x1c   :  { %836 = vmatprep.subr.bf16.mxu0 %v161_v23  ;;  %v128_v1 = vmul.f32 0.16666667, %v716_v61  ;;  %v1096_v3 = vadd.f32 %v129_v62, %v985_v12  ;;  %v728_v7 = vunpack.c.h.bf16 %v788_v2  ;;  %v723_v15 = vunpack.c.l.bf16 %v787_v4  ;;  %s1265_s9 = sld [smem:[#allocation3 + $0xf]]  ;;  %s945_s10 = smov [#allocation6]  }
  0x1d   :  { %v1102_v5 = vadd.f32 %v130_v63, %v987_v13  ;;  %v1105_v9 = vadd.f32 %v127_v0, %v981_v10  ;;  %v724_v18 = vunpack.c.h.bf16 %v787_v4  ;;  %v133_v13 = vmul.f32 0.16666667, %v727_v6  ;;  %v792_v63 = vld [vmem:[%s1309_s1 + $0x78] sm:$0xff]   ;;  %s1269_s11 = sshll.u32 %s945_s10, 4  ;;  %s534_s13 = scalar_lea.vmem [#allocation2], %s1227_s23  ;;  %s602_s11 = int_to_ptr.vmem [resolvable:$true] %s1269_s11 }
  0x1e   :  { %v1108_v14 = vadd.f32 %v128_v1, %v983_v11  ;;  %v131_v10 = vmul.f32 0.16666667, %v723_v15  ;;  %v790_v11 = vld [vmem:[%s1309_s1 + $0x68] sm:$0xff]   ;;  %v791_v1 = vld [vmem:[%s1309_s1 + $0x70] sm:$0xff]   ;;  %vm537_vm1 = vcmask 253952   ;;  %s540_s14 = scalar_lea.vmem [#allocation2], %s1233_s0  ;;  %p923_p6 = scmp.lt.s32.totalorder %s602_s11, %s602_s11 }
  0x1f   :  { %837 = vmatpush3.bf16.msra.mxu0 %v161_v23  ;;  %v134_v23 = vmul.f32 0.16666667, %v728_v7  ;;  %v132_v28 = vmul.f32 0.16666667, %v724_v18  ;;  %v1121_v34 = vadd.f32 %v133_v13, %v1005_v24  ;;  %v735_v38 = vunpack.c.l.bf16 %v790_v11  ;;  %s543_s15 = scalar_lea.vmem [#allocation2], %s1235_s24  ;;  %s548_s16 = scalar_lea.vmem [#allocation2], %s1239_s25 }
  0x20   :  { %838 = vmatprep.subr.bf16.mxu0 %v162_v30  ;;  %v736_v39 = vunpack.c.h.bf16 %v790_v11  ;;  %v743_v7 = vunpack.c.l.bf16 %v792_v63  ;;  %s551_s17 = scalar_lea.vmem [#allocation2], %s1241_s26  ;;  %s556_s18 = scalar_lea.vmem [#allocation2], %s1244_s27 }
  0x21   :  { %v1130_v44 = vadd.f32 %v132_v28, %v993_v17  ;;  %v137_v59 = vmul.f32 0.16666667, %v735_v38  ;;  %s559_s19 = scalar_lea.vmem [#allocation2], %s1246_s28  ;;  %s564_s20 = scalar_lea.vmem [#allocation2], %s1249_s29 }
  0x22   :  { %v138_v60 = vmul.f32 0.16666667, %v736_v39  ;;  %s567_s2 = scalar_lea.vmem [#allocation2], %s1251_s30  ;;  %s572_s21 = scalar_lea.vmem [#allocation2], %s1253_s4 }
  0x23   :  { %839 = vmatpush3.bf16.msra.mxu0 %v162_v30  ;;  %v1143_v4 = vadd.f32 %v137_v59, %v1023_v36  ;;  %s575_s22 = scalar_lea.vmem [#allocation2], %s1255_s5  ;;  %s583_s23 = scalar_lea.vmem [#allocation2], %s1260_s7 }
  0x24   :  { %840 = vmatprep.subr.bf16.mxu0 %v163_v35  ;;  %v1146_v6 = vadd.f32 %v138_v60, %v1025_v37  ;;  %s588_s0 = scalar_lea.vmem [#allocation2], %s1263_s8  ;;  %s591_s24 = scalar_lea.vmem [#allocation2], %s1265_s9 }
  0x25   :  { %s918_s25 = scalar_lea.vmem %s602_s11, 128 }
  0x26   :  { %p919_p5 = scmp.ne.s32.totalorder %s602_s11, %s918_s25  ;;  %p924_p7 = scmp.lt.s32.totalorder %s918_s25, %s918_s25 }
  0x27   :  { %841 = vmatpush3.bf16.msra.mxu0 %v163_v35  ;;  %v1124_v35 = vadd.f32 %v134_v23, %v1007_v25  ;;  %v141_v23 = vmul.f32 0.16666667, %v743_v7 }
  0x28   :  { %842 = vmatprep.subr.bf16.mxu0 %v164_v41  ;;  %p925_p8 = por %p924_p7, %p923_p6 }
  0x2a   :  { %p926_p9 = pnand %p925_p8, %p919_p5 }
  0x2b   :  { %843 = vmatpush3.bf16.msra.mxu0 %v164_v41  ;;  %v1127_v41 = vadd.f32 %v131_v10, %v991_v16 }
  0x2c   :  { %844 = vmatprep.subr.bf16.mxu0 %v165_v45 }
  0x2f   :  { %845 = vmatpush3.bf16.msra.mxu0 %v165_v45  ;;  %v731_v45 = vunpack.c.l.bf16 %v789_v32 }
  0x30   :  { %846 = vmatprep.subr.bf16.mxu0 %v166_v48 }
  0x31   :  { %v135_v62 = vmul.f32 0.16666667, %v731_v45 }
  0x33   :  { %847 = vmatpush3.bf16.msra.mxu0 %v166_v48  ;;  %v732_v48 = vunpack.c.h.bf16 %v789_v32  ;;  %v1149_v18 = vadd.f32 %v135_v62, %v1015_v29 }
  0x35   :  { %v136_v17 = vmul.f32 0.16666667, %v732_v48 }
  0x36   :  { %849 = vmatmul.mubr.bf16.vlgmr.msra.gmra.mrb[0].mxu0 %v1047_v49 }
  0x37   :  { %852 = vmatprep.mubr.bf16.mxu0 %v1052_v50 }
  0x3e   :  { %853 = vmatmul.mubr.bf16.gmra.mrb[4].mxu0 %v1059_v51 }
  0x3f   :  { %856 = vmatprep.mubr.bf16.mxu0 %v1064_v52 }
  0x46   :  { %857 = vmatmul.mubr.bf16.gmra.mrb[8].mxu0 %v1071_v53 }
  0x47   :  { %860 = vmatprep.mubr.bf16.mxu0 %v1076_v54 }
  0x4e   :  { %861 = vmatmul.mubr.bf16.gmra.mrb[12].mxu0 %v1083_v55 }
 0x109   :  { %v850_v8 = vpop.f32.mrb[0].mxu0 }
 0x10a   :  { %v314_v12 = vadd.f32 %v850_v8, %v1096_v3  ;;  %v249_v19 = vpop.f32.mrb[1].mxu0  ;;  %v744_v8 = vunpack.c.h.bf16 %v792_v63 }
 0x10b   :  { %v851_v20 = vpop.f32.mrb[2].mxu0  ;;  %v312_v26 = vadd.f32 %v249_v19, %v1105_v9  ;;  %v739_v19 = vunpack.c.l.bf16 %v791_v1 }
 0x10c   :  { %v315_v21 = vadd.f32 %v851_v20, %v1102_v5  ;;  %v252_v22 = vpop.f32.mrb[3].mxu0  ;;  %v740_v20 = vunpack.c.h.bf16 %v791_v1 }
 0x10d   :  { %v313_v27 = vadd.f32 %v252_v22, %v1108_v14  ;;  %v139_v10 = vmul.f32 0.16666667, %v739_v19 }
 0x10e   :  { %v393_v30 = vpack.c.bf16 %v315_v21, %v314_v12  ;;  %v1152_v12 = vadd.f32 %v136_v17, %v1019_v31  ;;  %v140_v31 = vmul.f32 0.16666667, %v740_v20 }
 0x10f   :  { %v392_v33 = vpack.c.bf16 %v313_v27, %v312_v26  ;;  %v142_v26 = vmul.f32 0.16666667, %v744_v8  ;;  %v1165_v38 = vadd.f32 %v139_v10, %v1032_v42 }
 0x110   :  { %v1168_v39 = vadd.f32 %v140_v31, %v1034_v43  ;;  %v793_v43 = vld [vmem:[%s1309_s1 + $0x8] sm:$0xff]  }
 0x111   :  { %v854_v40 = vpop.f32.mrb[4].mxu0  ;;  %864 = vmatprep.subr.bf16.mxu1 %v392_v33  ;;  %v1162_v32 = vadd.f32 %v142_v26, %v1040_v47 }
 0x112   :  { %v265_v56 = vpop.f32.mrb[5].mxu0  ;;  %865 = vmatpush3.bf16.msra.mxu1 %v392_v33  ;;  %v318_v24 = vadd.f32 %v854_v40, %v1121_v34 }
 0x113   :  { %v855_v57 = vpop.f32.mrb[6].mxu0  ;;  %866 = vmatprep.subr.bf16.mxu1 %v393_v30  ;;  %v316_v61 = vadd.f32 %v265_v56, %v1127_v41 }
 0x114   :  { %v319_v25 = vadd.f32 %v855_v57, %v1124_v35  ;;  %v268_v58 = vpop.f32.mrb[7].mxu0 }
 0x115   :  { %v317_v16 = vadd.f32 %v268_v58, %v1130_v44  ;;  %v752_v58 = vunpack.c.h.bf16 %v793_v43 }
 0x116   :  { %v395_v0 = vpack.c.bf16 %v319_v25, %v318_v24  ;;  %867 = vmatpush3.bf16.msra.mxu1 %v393_v30  ;;  %v1159_v30 = vadd.f32 %v141_v23, %v1038_v46  ;;  %v751_v25 = vunpack.c.l.bf16 %v793_v43 }
 0x117   :  { %v394_v2 = vpack.c.bf16 %v317_v16, %v316_v61 }
 0x118   :  { %v362_v59 = vmul.f32 0.33333334, %v751_v25 }
 0x119   :  { %v858_v15 = vpop.f32.mrb[8].mxu0  ;;  %868 = vmatprep.subr.bf16.mxu1 %v394_v2 }
 0x11a   :  { %v281_v21 = vpop.f32.mrb[9].mxu0  ;;  %869 = vmatpush3.bf16.msra.mxu1 %v394_v2  ;;  %v322_v36 = vadd.f32 %v858_v15, %v1143_v4  ;;  %v378_v61 = vadd.f32 %v362_v59, %v1096_v3  ;;  %v797_v3 = vld [vmem:[%s1309_s1 + $0x28] sm:$0xff]  }
 0x11b   :  { %v859_v22 = vpop.f32.mrb[10].mxu0  ;;  %870 = vmatprep.subr.bf16.mxu1 %v395_v0  ;;  %v320_v27 = vadd.f32 %v281_v21, %v1149_v18  ;;  %v767_v26 = vunpack.c.l.bf16 %v797_v3  ;;  %v768_v31 = vunpack.c.h.bf16 %v797_v3 }
 0x11c   :  { %v323_v37 = vadd.f32 %v859_v22, %v1146_v6  ;;  %v284_v13 = vpop.f32.mrb[11].mxu0 }
 0x11d   :  { %v321_v29 = vadd.f32 %v284_v13, %v1152_v12 }
 0x11e   :  { %v397_v28 = vpack.c.bf16 %v323_v37, %v322_v36  ;;  %871 = vmatpush3.bf16.msra.mxu1 %v395_v0 }
 0x11f   :  { %v396_v11 = vpack.c.bf16 %v321_v29, %v320_v27 }
 0x121   :  { %v862_v33 = vpop.f32.mrb[12].mxu0  ;;  %872 = vmatprep.subr.bf16.mxu1 %v396_v11 }
 0x122   :  { %v297_v40 = vpop.f32.mrb[13].mxu0  ;;  %873 = vmatpush3.bf16.msra.mxu1 %v396_v11  ;;  %v326_v48 = vadd.f32 %v862_v33, %v1159_v30 }
 0x123   :  { %v863_v45 = vpop.f32.mrb[14].mxu0  ;;  %874 = vmatprep.subr.bf16.mxu1 %v397_v28  ;;  %v324_v47 = vadd.f32 %v297_v40, %v1165_v38 }
 0x124   :  { %v327_v46 = vadd.f32 %v863_v45, %v1162_v32  ;;  %v300_v56 = vpop.f32.mrb[15].mxu0 }
 0x125   :  { %v325_v57 = vadd.f32 %v300_v56, %v1168_v39 }
 0x126   :  { %v399_v24 = vpack.c.bf16 %v327_v46, %v326_v48  ;;  %875 = vmatpush3.bf16.msra.mxu1 %v397_v28  ;;  %v370_v48 = vmul.f32 0.33333334, %v767_v26 }
 0x127   :  { %v398_v42 = vpack.c.bf16 %v325_v57, %v324_v47 }
 0x128   :  { %v386_v43 = vadd.f32 %v370_v48, %v1143_v4 }
 0x129   :  { %876 = vmatprep.subr.bf16.mxu1 %v398_v42 }
 0x12a   :  { %877 = vmatpush3.bf16.msra.mxu1 %v398_v42 }
 0x12b   :  { %878 = vmatprep.subr.bf16.mxu1 %v399_v24 }
 0x12e   :  { %879 = vmatpush3.bf16.msra.mxu1 %v399_v24 }
 0x131   :  { %881 = vmatmul.mubr.bf16.vlgmr.msra.gmra.mrb[0].mxu1 %v1047_v49  ;;  %v746_v49 = vld [vmem:[%s1309_s1] sm:$0xff]  }
 0x132   :  { %884 = vmatprep.mubr.bf16.mxu1 %v1052_v50  ;;  %v747_v50 = vunpack.c.l.bf16 %v746_v49 }
 0x139   :  { %885 = vmatmul.mubr.bf16.gmra.mrb[4].mxu1 %v1059_v51  ;;  %v748_v51 = vunpack.c.h.bf16 %v746_v49 }
 0x13a   :  { %888 = vmatprep.mubr.bf16.mxu1 %v1064_v52  ;;  %v360_v52 = vmul.f32 0.33333334, %v747_v50 }
 0x13b   :  { %v361_v60 = vmul.f32 0.33333334, %v748_v51 }
 0x13c   :  { %v376_v62 = vadd.f32 %v360_v52, %v1105_v9 }
 0x13d   :  { %v377_v2 = vadd.f32 %v361_v60, %v1108_v14  ;;  %v796_v14 = vld [vmem:[%s1309_s1 + $0x20] sm:$0xff]  }
 0x13e   :  { %v763_v29 = vunpack.c.l.bf16 %v796_v14  ;;  %v764_v33 = vunpack.c.h.bf16 %v796_v14 }
 0x140   :  { %v368_v47 = vmul.f32 0.33333334, %v763_v29  ;;  %v369_v42 = vmul.f32 0.33333334, %v764_v33 }
 0x141   :  { %889 = vmatmul.mubr.bf16.gmra.mrb[8].mxu1 %v1071_v53  ;;  %v795_v53 = vld [vmem:[%s1309_s1 + $0x18] sm:$0xff]  }
 0x142   :  { %892 = vmatprep.mubr.bf16.mxu1 %v1076_v54  ;;  %v363_v54 = vmul.f32 0.33333334, %v752_v58  ;;  %v759_v16 = vunpack.c.l.bf16 %v795_v53  ;;  %v760_v0 = vunpack.c.h.bf16 %v795_v53  ;;  %v384_v50 = vadd.f32 %v368_v47, %v1149_v18 }
 0x143   :  { %v385_v52 = vadd.f32 %v369_v42, %v1152_v12 }
 0x144   :  { %v379_v63 = vadd.f32 %v363_v54, %v1102_v5  ;;  %v366_v19 = vmul.f32 0.33333334, %v759_v16  ;;  %v367_v36 = vmul.f32 0.33333334, %v760_v0 }
 0x146   :  { %v382_v23 = vadd.f32 %v366_v19, %v1121_v34  ;;  %v383_v10 = vadd.f32 %v367_v36, %v1124_v35  ;;  %v799_v34 = vld [vmem:[%s1309_s1 + $0x38] sm:$0xff]  }
 0x147   :  { %v775_v49 = vunpack.c.l.bf16 %v799_v34  ;;  %v776_v51 = vunpack.c.h.bf16 %v799_v34 }
 0x149   :  { %893 = vmatmul.mubr.bf16.gmra.mrb[12].mxu1 %v1083_v55  ;;  %v794_v55 = vld [vmem:[%s1309_s1 + $0x10] sm:$0xff]   ;;  %v374_v60 = vmul.f32 0.33333334, %v775_v49 }
 0x14a   :  { %v755_v17 = vunpack.c.l.bf16 %v794_v55  ;;  %v756_v7 = vunpack.c.h.bf16 %v794_v55 }
 0x14c   :  { %v364_v22 = vmul.f32 0.33333334, %v755_v17  ;;  %v365_v13 = vmul.f32 0.33333334, %v756_v7 }
 0x14e   :  { %v380_v27 = vadd.f32 %v364_v22, %v1127_v41  ;;  %v381_v11 = vadd.f32 %v365_v13, %v1130_v44  ;;  %v798_v41 = vld [vmem:[%s1309_s1 + $0x30] sm:$0xff]   ;;  %v371_v44 = vmul.f32 0.33333334, %v768_v31  ;;  %s1225_s1 = sld [smem:[#allocation3]] }
 0x14f   :  { %v771_v25 = vunpack.c.l.bf16 %v798_v41  ;;  %v772_v53 = vunpack.c.h.bf16 %v798_v41 }
 0x150   :  { %v387_v58 = vadd.f32 %v371_v44, %v1146_v6  ;;  %v375_v6 = vmul.f32 0.33333334, %v776_v51 }
 0x151   :  { %v373_v12 = vmul.f32 0.33333334, %v772_v53 }
 0x154   :  { %s531_s12 = scalar_lea.vmem [#allocation2], %s1225_s1  ;;  %s580_s1 = scalar_lea.vmem [#allocation2], %s1258_s6 }
 0x204   :  { %v882_v1 = vpop.f32.mrb[0].mxu1 }
 0x205   :  { %v499_v8 = vadd.f32 %v882_v1, %v378_v61  ;;  %v434_v15 = vpop.f32.mrb[1].mxu1  ;;  %v372_v61 = vmul.f32 0.33333334, %v771_v25  ;;  %v391_v1 = vadd.f32 %v375_v6, %v1162_v32 }
 0x206   :  { %v497_v20 = vadd.f32 %v434_v15, %v376_v62  ;;  %v883_v21 = vpop.f32.mrb[2].mxu1 }
 0x207   :  { %516 = vst.msk [vmem:[#allocation2 + $0x10] sm:$0xff] %vm513_vm0, %v499_v8  ;;  %v500_v9 = vadd.f32 %v883_v21, %v379_v63  ;;  %v437_v5 = vpop.f32.mrb[3].mxu1  ;;  %v390_v63 = vadd.f32 %v374_v60, %v1159_v30  ;;  %v388_v0 = vadd.f32 %v372_v61, %v1165_v38  ;;  %v389_v30 = vadd.f32 %v373_v12, %v1168_v39 }
 0x208   :  { %514 = vst.msk [vmem:[#allocation2] sm:$0xff] %vm513_vm0, %v497_v20  ;;  %v498_v37 = vadd.f32 %v437_v5, %v377_v2 }
 0x209   :  { %517 = vst.msk [vmem:[#allocation2 + $0x18] sm:$0xff] %vm513_vm0, %v500_v9 }
 0x20a   :  { %515 = vst.msk [vmem:[#allocation2 + $0x8] sm:$0xff] %vm513_vm0, %v498_v37 }
 0x20c   :  { %v886_v28 = vpop.f32.mrb[4].mxu1 }
 0x20d   :  { %v503_v40 = vadd.f32 %v886_v28, %v382_v23  ;;  %v450_v45 = vpop.f32.mrb[5].mxu1 }
 0x20e   :  { %v501_v46 = vadd.f32 %v450_v45, %v380_v27  ;;  %v887_v56 = vpop.f32.mrb[6].mxu1 }
 0x20f   :  { %520 = vst.msk [vmem:[#allocation2 + $0x30] sm:$0xff] %vm513_vm0, %v503_v40  ;;  %v504_v35 = vadd.f32 %v887_v56, %v383_v10  ;;  %v453_v57 = vpop.f32.mrb[7].mxu1 }
 0x210   :  { %518 = vst.msk [vmem:[#allocation2 + $0x20] sm:$0xff] %vm513_vm0, %v501_v46  ;;  %v502_v24 = vadd.f32 %v453_v57, %v381_v11 }
 0x211   :  { %521 = vst.msk [vmem:[#allocation2 + $0x38] sm:$0xff] %vm513_vm0, %v504_v35 }
 0x212   :  { %519 = vst.msk [vmem:[#allocation2 + $0x28] sm:$0xff] %vm513_vm0, %v502_v24 }
 0x214   :  { %v890_v59 = vpop.f32.mrb[8].mxu1 }
 0x215   :  { %v507_v54 = vadd.f32 %v890_v59, %v386_v43  ;;  %v466_v55 = vpop.f32.mrb[9].mxu1 }
 0x216   :  { %v505_v16 = vadd.f32 %v466_v55, %v384_v50  ;;  %v891_v62 = vpop.f32.mrb[10].mxu1 }
 0x217   :  { %524 = vst.msk [vmem:[#allocation2 + $0x50] sm:$0xff] %vm513_vm0, %v507_v54  ;;  %v508_v4 = vadd.f32 %v891_v62, %v387_v58  ;;  %v469_v18 = vpop.f32.mrb[11].mxu1 }
 0x218   :  { %522 = vst.msk [vmem:[#allocation2 + $0x40] sm:$0xff] %vm513_vm0, %v505_v16  ;;  %v506_v17 = vadd.f32 %v469_v18, %v385_v52 }
 0x219   :  { %525 = vst.msk [vmem:[#allocation2 + $0x58] sm:$0xff] %vm513_vm0, %v508_v4 }
 0x21a   :  { %523 = vst.msk [vmem:[#allocation2 + $0x48] sm:$0xff] %vm513_vm0, %v506_v17 }
 0x21c   :  { %v894_v2 = vpop.f32.mrb[12].mxu1 }
 0x21d   :  { %v511_v7 = vadd.f32 %v894_v2, %v390_v63  ;;  %v482_v8 = vpop.f32.mrb[13].mxu1 }
 0x21e   :  { %v509_v38 = vadd.f32 %v482_v8, %v388_v0  ;;  %v895_v32 = vpop.f32.mrb[14].mxu1 }
 0x21f   :  { %528 = vst.msk [vmem:[#allocation2 + $0x70] sm:$0xff] %vm513_vm0, %v511_v7  ;;  %v512_v15 = vadd.f32 %v895_v32, %v391_v1  ;;  %v485_v19 = vpop.f32.mrb[15].mxu1 }
 0x220   :  { %526 = vst.msk [vmem:[#allocation2 + $0x60] sm:$0xff] %vm513_vm0, %v509_v38  ;;  %v510_v39 = vadd.f32 %v485_v19, %v389_v30 }
 0x221   :  { %529 = vst.msk [vmem:[#allocation2 + $0x78] sm:$0xff] %vm513_vm0, %v512_v15 }
 0x222   :  { %527 = vst.msk [vmem:[#allocation2 + $0x68] sm:$0xff] %vm513_vm0, %v510_v39 }
 0x229   :  { %v532_v20 = vld [vmem:[%s531_s12] sm:$0x1] }
 0x22a   :  { %v535_v21 = vld [vmem:[%s534_s13] sm:$0x1] }
 0x22b   :  { %v541_v22 = vld [vmem:[%s540_s14] sm:$0x1]  ;;  %v536_v3 = vmul.f32 %v535_v21, %v532_v20 }
 0x22c   :  { %v544_v9 = vld [vmem:[%s543_s15] sm:$0x1] }
 0x22d   :  { %v549_v5 = vld [vmem:[%s548_s16] sm:$0x1]  ;;  %v545_v14 = vmul.f32 %v544_v9, %v541_v22  ;;  %538 = vst.msk [vmem:[#allocation6] sm:$0x1] %vm537_vm1, %v536_v3 }
 0x22e   :  { %v552_v36 = vld [vmem:[%s551_s17] sm:$0x1] }
 0x22f   :  { %v553_v37 = vmul.f32 %v552_v36, %v549_v5  ;;  %v557_v13 = vld [vmem:[%s556_s18] sm:$0x1]  ;;  %546 = vst.msk [vmem:[#allocation6 + $0x1] sm:$0x1] %vm537_vm1, %v545_v14 }
 0x230   :  { %v560_v23 = vld [vmem:[%s559_s19] sm:$0x1] }
 0x231   :  { %v565_v26 = vld [vmem:[%s564_s20] sm:$0x1]  ;;  %v561_v27 = vmul.f32 %v560_v23, %v557_v13  ;;  %554 = vst.msk [vmem:[#allocation6 + $0x2] sm:$0x1] %vm537_vm1, %v553_v37 }
 0x232   :  { %v568_v29 = vld [vmem:[%s567_s2] sm:$0x1] }
 0x233   :  { %v573_v10 = vld [vmem:[%s572_s21] sm:$0x1]  ;;  %v569_v28 = vmul.f32 %v568_v29, %v565_v26  ;;  %562 = vst.msk [vmem:[#allocation6 + $0x3] sm:$0x1] %vm537_vm1, %v561_v27 }
 0x234   :  { %v576_v31 = vld [vmem:[%s575_s22] sm:$0x1] }
 0x235   :  { %v577_v11 = vmul.f32 %v576_v31, %v573_v10  ;;  %v581_v33 = vld [vmem:[%s580_s1] sm:$0x1]  ;;  %570 = vst.msk [vmem:[#allocation6 + $0x4] sm:$0x1] %vm537_vm1, %v569_v28 }
 0x236   :  { %v584_v40 = vld [vmem:[%s583_s23] sm:$0x1] }
 0x237   :  { %v589_v45 = vld [vmem:[%s588_s0] sm:$0x1]  ;;  %v585_v48 = vmul.f32 %v584_v40, %v581_v33  ;;  %578 = vst.msk [vmem:[#allocation6 + $0x5] sm:$0x1] %vm537_vm1, %v577_v11 }
 0x238   :  { %v592_v46 = vld [vmem:[%s591_s24] sm:$0x1] }
 0x239   :  { %v593_v56 = vmul.f32 %v592_v46, %v589_v45  ;;  %586 = vst.msk [vmem:[#allocation6 + $0x6] sm:$0x1] %vm537_vm1, %v585_v48 }
 0x23b   :  { %594 = vst.msk [vmem:[#allocation6 + $0x7] sm:$0x1] %vm537_vm1, %v593_v56 }
 0x23c   :  { %929 = shalt.err (!%p926_p9)
}
 0x23d   :  { %s930_s28 = scalar_lea.hbm %s1311_s3, 128 }
 0x23e   :  { %p931_p10 = scmp.ne.s32.totalorder %s1311_s3, %s930_s28  ;;  %p934_p11 = scmp.lt.u32.totalorder %s930_s28, %s1311_s3 }
 0x240   :  { %p936_p12 = pnand %p934_p11, %p931_p10 }
 0x242   :  { %939 = shalt.err (!%p936_p12)
}
 0x243   :  { %604 = dma.vmem_to_hbm [thread:$0]  %s602_s11, 128, %s1311_s3, [#allocation4]  }
 0x244   :  { %942 = dma.done.wait [#allocation4], 128  }
 0x245   :  { %943 = vsyncadd [#allocation4], 4294967168 }
 0x246   :  { %608 = vsyncpa [#allocation4], 1 }
 0x247   :  { %609 = vsyncpa [#allocation5], 1 }

</bundles_post_ra>
